<compile_context>
chip_gen: v7x
topology: tpu7x:2x2x1
jax: 0.10.0
libtpu: 0.0.40
codegen_flags: <defaults>
</compile_context>

<pallas_src>
import functools

import jax
import jax.numpy as jnp
from jax.experimental import pallas as pl
from jax.experimental.pallas import tpu as pltpu

_LANES = 128


def _int_pow(x, n: int):
    """x ** n for a static python int n >= 1 via repeated squaring (VALU only)."""
    assert isinstance(n, int) and n >= 1
    result = None
    base = x
    while n > 0:
        if n & 1:
            result = base if result is None else result * base
        n >>= 1
        if n:
            base = base * base
    return result


def _sq_lp_partial_kernel(pred_ref, tgt_ref, out_ref, *, p, ragged,
                          valid_tiles_in_last_block):
    # pred_ref / tgt_ref: (tiles_per_block, SUB, 128) in the storage dtype.
    # Upcast inside the kernel (keeps HBM traffic at the narrow dtype; v5e has
    # no bf16 VPU so the f32 upcast is required before the sub/mul anyway).
    diff = pred_ref[...].astype(jnp.float32) - tgt_ref[...].astype(jnp.float32)
    powed = _int_pow(diff, p)
    if p % 2 != 0:
        powed = jnp.abs(powed)

    if not ragged:
        # Reduce the leading (vreg-count) axis only: pure VPU elementwise adds,
        # minor (SUB, 128) dims stay intact -> no XLU cross-lane work here.
        out_ref[...] = jnp.sum(powed, axis=0)
    else:
        # Only the last grid block can contain out-of-bounds (garbage) tiles;
        # mask them there and keep every other step on the cheap path.
        is_last = pl.program_id(0) == pl.num_programs(0) - 1

        @pl.when(jnp.logical_not(is_last))
        def _():
            out_ref[...] = jnp.sum(powed, axis=0)

        @pl.when(is_last)
        def _():
            ids = jax.lax.broadcasted_iota(jnp.int32, powed.shape, 0)
            masked = jnp.where(ids < valid_tiles_in_last_block, powed, 0.0)
            out_ref[...] = jnp.sum(masked, axis=0)


def _max_tiles_per_block():
    """Per-generation block size (vreg tiles per grid step).

    512 tiles  -> 2 MiB/input/buffer -> 8 MiB double-buffered inputs (fits the
                  v5e 16 MiB scoped-VMEM default).
    1024 tiles -> 4 MiB/input/buffer -> 16 MiB double-buffered inputs (fits the
                  v6e/v7x 32 MiB scoped-VMEM default).
    """
    try:
        kind = jax.devices()[0].device_kind.lower()
    except Exception:  # pragma: no cover - defensive
        kind = ""
    if ("v6" in kind) or ("7" in kind):
        return 1024
    return 512


def squared_lp_norm_loss(predictions, targets, *, p=2,
                         time_reduction="mean", batch_reduction="mean"):
    """Pallas implementation of SquaredLpNormLoss.forward -> scalar."""
    assert predictions.shape == targets.shape and predictions.ndim == 3
    assert isinstance(p, int) and p >= 1
    if time_reduction not in ("mean", "sum") or batch_reduction not in ("mean", "sum"):
        # TODO(synk): 'none' reductions return non-scalar tensors; not implemented.
        raise NotImplementedError("only 'mean'/'sum' reductions are supported")
    # TODO(synk): timewise_weights (per-time-step weighting) not implemented.

    B, T, D = predictions.shape
    total = B * T * D

    # Keep 16-bit floats in their storage dtype through the DMA (halves HBM
    # reads); anything else runs as f32.
    dtype = jnp.promote_types(predictions.dtype, targets.dtype)
    if dtype == jnp.dtype(jnp.bfloat16) or dtype == jnp.dtype(jnp.float16):
        sublanes = 16          # packed 16-bit vreg tile is (16, 128)
    elif dtype == jnp.dtype(jnp.float32):
        sublanes = 8
    else:
        dtype = jnp.dtype(jnp.float32)
        sublanes = 8

    pred = predictions.astype(dtype).reshape(-1)
    tgt = targets.astype(dtype).reshape(-1)

    # Lane-dense retiling: pad with zeros only to the next single vreg tile
    # (zero diff contributes nothing); in the common divisible case this is a
    # free reshape with no HBM copy at all.
    tile_elems = sublanes * _LANES
    num_tiles = pl.cdiv(total, tile_elems)
    padded = num_tiles * tile_elems
    if padded != total:
        pred = jnp.pad(pred, (0, padded - total))
        tgt = jnp.pad(tgt, (0, padded - total))
    pred = pred.reshape(num_tiles, sublanes, _LANES)
    tgt = tgt.reshape(num_tiles, sublanes, _LANES)

    # Block size: as large as comfortably fits scoped VMEM for this chip, but
    # keep >= 2 grid blocks when possible so both v7x TensorCores get work.
    max_tiles = _max_tiles_per_block()
    tiles_per_block = max(1, min(max_tiles, pl.cdiv(num_tiles, 2)))
    num_blocks = pl.cdiv(num_tiles, tiles_per_block)
    rem = num_tiles - (num_blocks - 1) * tiles_per_block   # valid tiles in last block
    ragged = rem != tiles_per_block

    itemsize = jnp.dtype(dtype).itemsize
    cost = pl.CostEstimate(
        flops=3 * padded,
        transcendentals=0,
        bytes_accessed=2 * padded * itemsize + num_blocks * sublanes * _LANES * 4,
    )

    kernel = functools.partial(
        _sq_lp_partial_kernel, p=p, ragged=ragged,
        valid_tiles_in_last_block=rem)

    partials = pl.pallas_call(
        kernel,
        out_shape=jax.ShapeDtypeStruct((num_blocks, sublanes, _LANES), jnp.float32),
        grid_spec=pltpu.PrefetchScalarGridSpec(
            num_scalar_prefetch=0,
            grid=(num_blocks,),
            in_specs=[
                pl.BlockSpec((tiles_per_block, sublanes, _LANES),
                             lambda i: (i, 0, 0)),
                pl.BlockSpec((tiles_per_block, sublanes, _LANES),
                             lambda i: (i, 0, 0)),
            ],
            # Each grid step owns its own partial-sum block (no resident
            # accumulator) -> safe with 'parallel' / megacore sharding.
            out_specs=pl.BlockSpec((None, sublanes, _LANES),
                                   lambda i: (i, 0, 0)),
        ),
        compiler_params=pltpu.CompilerParams(
            dimension_semantics=("parallel",),
        ),
        cost_estimate=cost,
    )(pred, tgt)

    # Final tiny reduction (num_blocks * 4-8 KiB) + static reduction scales.
    result = jnp.sum(partials)
    if time_reduction == "mean":
        result = result / T
    if batch_reduction == "mean":
        result = result / B
    return result


def _reference(predictions, targets, p=2,
               time_reduction="mean", batch_reduction="mean"):
    diff = predictions - targets
    if p % 2 == 0:
        squarednorms = jnp.sum(diff ** p, axis=2)
    else:
        squarednorms = jnp.sum(jnp.abs(diff ** p), axis=2)
    if time_reduction == "mean":
        means = jnp.mean(squarednorms, axis=1)
    else:
        means = jnp.sum(squarednorms, axis=1)
    if batch_reduction == "mean":
        return jnp.mean(means)
    return jnp.sum(means)


if __name__ == "__main__":
    key = jax.random.PRNGKey(0)
    k1, k2, k3, k4 = jax.random.split(key, 4)

    # Small shapes consistent with the module: batch=2, time=8, feature dim=4
    # (dim=2 is the norm axis, dim=1 the time axis, dim=0 the batch axis).
    B, T, D = 2, 8, 4
    predictions = jax.random.normal(k1, (B, T, D), dtype=jnp.float32)
    targets = jax.random.normal(k2, (B, T, D), dtype=jnp.float32)

    for tr, br in (("mean", "mean"), ("sum", "mean"), ("mean", "sum"), ("sum", "sum")):
        out = squared_lp_norm_loss(predictions, targets,
                                   time_reduction=tr, batch_reduction=br)
        jax.block_until_ready(out)
        ref = _reference(predictions, targets, time_reduction=tr, batch_reduction=br)
        assert jnp.allclose(out, ref, atol=1e-5, rtol=1e-4), (tr, br, out, ref)

    # Odd norm power (p=3) path.
    out3 = squared_lp_norm_loss(predictions, targets, p=3)
    jax.block_until_ready(out3)
    ref3 = _reference(predictions, targets, p=3)
    assert jnp.allclose(out3, ref3, atol=1e-5, rtol=1e-4), (out3, ref3)

    # A shape whose flattened size neither fills whole vreg tiles nor whole
    # grid blocks (exercises the in-kernel partial-last-block masking path).
    B2, T2, D2 = 4, 129, 4
    p2 = jax.random.normal(k3, (B2, T2, D2), dtype=jnp.float32)
    t2 = jax.random.normal(k4, (B2, T2, D2), dtype=jnp.float32)
    out2 = squared_lp_norm_loss(p2, t2)
    jax.block_until_ready(out2)
    ref2 = _reference(p2, t2)
    assert jnp.allclose(out2, ref2, atol=1e-5, rtol=1e-4), (out2, ref2)

    # bf16 inputs stay bf16 through the DMA (halved HBM traffic) and are
    # upcast to f32 only inside the kernel.
    pb = p2.astype(jnp.bfloat16)
    tb = t2.astype(jnp.bfloat16)
    outb = squared_lp_norm_loss(pb, tb)
    jax.block_until_ready(outb)
    refb = _reference(pb.astype(jnp.float32), tb.astype(jnp.float32))
    assert jnp.allclose(outb, refb, atol=1e-4, rtol=1e-3), (outb, refb)

    print("KERNEL_OK")
</pallas_src>

<mosaic_0001>
module attributes {stable_mosaic.version = 11 : i64} {
  func.func @_sq_lp_partial_kernel(%arg0: i32, %arg1: memref<1x8x128xf32, #tpu.memory_space<vmem>>, %arg2: memref<1x8x128xf32, #tpu.memory_space<vmem>>, %arg3: memref<1x8x128xf32, #tpu.memory_space<vmem>>) attributes {dimension_semantics = [#tpu.dimension_semantics<parallel>], iteration_bounds = array<i64: 1>, scalar_prefetch = 0 : i64, scratch_operands = 0 : i64, tpu.core_type = #tpu.core_type<tc>, window_params = [{transform_indices = @transform_0, window_bounds = array<i64: 1, 8, 128>}, {transform_indices = @transform_1, window_bounds = array<i64: 1, 8, 128>}, {transform_indices = @transform_2, window_bounds = array<i64: 1, 8, 128>}]} {
    %c0 = arith.constant 0 : index
    %c0_0 = arith.constant 0 : index
    %c0_1 = arith.constant 0 : index
    %0 = vector.load %arg1[%c0, %c0_0, %c0_1] : memref<1x8x128xf32, #tpu.memory_space<vmem>>, vector<1x8x128xf32>
    %c0_2 = arith.constant 0 : index
    %c0_3 = arith.constant 0 : index
    %c0_4 = arith.constant 0 : index
    %1 = vector.load %arg2[%c0_2, %c0_3, %c0_4] : memref<1x8x128xf32, #tpu.memory_space<vmem>>, vector<1x8x128xf32>
    %2 = arith.subf %0, %1 : vector<1x8x128xf32>
    %3 = arith.mulf %2, %2 : vector<1x8x128xf32>
    %cst = arith.constant dense<0.000000e+00> : vector<8x128xf32>
    %4 = vector.multi_reduction <add>, %3, %cst [0] : vector<1x8x128xf32> to vector<8x128xf32>
    %c0_5 = arith.constant 0 : index
    %c0_6 = arith.constant 0 : index
    %c0_7 = arith.constant 0 : index
    %5 = vector.load %arg3[%c0_5, %c0_6, %c0_7] : memref<1x8x128xf32, #tpu.memory_space<vmem>>, vector<1x8x128xf32>
    %6 = vector.shape_cast %5 : vector<1x8x128xf32> to vector<8x128xf32>
    %7 = vector.shape_cast %4 : vector<8x128xf32> to vector<1x8x128xf32>
    tpu.vector_store %arg3[%c0_5, %c0_6, %c0_7], %7 {strides = array<i32>} : memref<1x8x128xf32, #tpu.memory_space<vmem>>, vector<1x8x128xf32>,
    return
  }
  func.func @transform_0(%arg0: i32) -> (i32, i32, i32) {
    %c0_i32 = arith.constant 0 : i32
    %c0_i32_0 = arith.constant 0 : i32
    %c0_i32_1 = arith.constant 0 : i32
    return %arg0, %c0_i32, %c0_i32_0 : i32, i32, i32
  }
  func.func @transform_1(%arg0: i32) -> (i32, i32, i32) {
    %c0_i32 = arith.constant 0 : i32
    %c0_i32_0 = arith.constant 0 : i32
    %c0_i32_1 = arith.constant 0 : i32
    return %arg0, %c0_i32, %c0_i32_0 : i32, i32, i32
  }
  func.func @transform_2(%arg0: i32) -> (i32, i32, i32) {
    %c0_i32 = arith.constant 0 : i32
    %c0_i32_0 = arith.constant 0 : i32
    %c0_i32_1 = arith.constant 0 : i32
    return %arg0, %c0_i32, %c0_i32_0 : i32, i32, i32
  }
}

</mosaic_0001>

<bundles_post_ra>
// kernel: tpu_custom_call.1
= control target key start
LH: loop header
LB: loop body
LE: loop exit
PB: predicated region body
PF: predicated region fallthrough
CT: control target
= control target key end

     0   :  { %7 = vsyncpa [#allocation3], 0  ;;  %s187_s0 = inlined_call_operand.hbm [shape: f32[1,8,128], index: 0, kind: input, shape index: {}]   ;;  %s188_s1 = inlined_call_operand.hbm [shape: f32[1,8,128], index: 1, kind: input, shape index: {}]   ;;  %s189_s2 = inlined_call_operand.hbm [shape: f32[1,8,128], index: 2, kind: output, shape index: {}]  }
   0x1   :  { %8 = vsyncpa [#allocation6], 0 }
   0x2   :  { %9 = vsyncpa [#allocation4], 0  ;;  %s133_s9 = smov [#allocation2]   ;;  %s134_s11 = smov [#allocation5]  }
   0x3   :  { %s16_s10 = sshll.u32 %s133_s9, 4  ;;  %s26_s12 = sshll.u32 %s134_s11, 4  ;;  %s17_s10 = int_to_ptr.vmem [resolvable:$true] %s16_s10  ;;  %s27_s12 = int_to_ptr.vmem [resolvable:$true] %s26_s12 }
   0x4   :  { %s61_s15 = scalar_lea.hbm %s187_s0, 128 }
   0x5   :  { %p62_p0 = scmp.ne.s32.totalorder %s187_s0, %s61_s15  ;;  %p65_p1 = scmp.lt.u32.totalorder %s61_s15, %s187_s0 }
   0x7   :  { %p67_p2 = pnand %p65_p1, %p62_p0 }
   0x9   :  { %70 = shalt.err (!%p67_p2)
}
   0xa   :  { %s71_s20 = scalar_lea.vmem %s17_s10, 128  ;;  %p76_p4 = scmp.lt.s32.totalorder %s17_s10, %s17_s10 }
   0xb   :  { %p72_p3 = scmp.ne.s32.totalorder %s17_s10, %s71_s20  ;;  %p77_p5 = scmp.lt.s32.totalorder %s71_s20, %s71_s20 }
   0xd   :  { %p78_p6 = por %p77_p5, %p76_p4 }
   0xf   :  { %p79_p7 = pnand %p78_p6, %p72_p3 }
  0x11   :  { %82 = shalt.err (!%p79_p7)
}
  0x12   :  { %19 = dma.hbm_to_vmem [thread:$0]  %s187_s0, 128, %s17_s10, [#allocation3]  }
  0x13   :  { %s83_s25 = scalar_lea.hbm %s188_s1, 128 }
  0x14   :  { %p84_p8 = scmp.ne.s32.totalorder %s188_s1, %s83_s25  ;;  %p87_p9 = scmp.lt.u32.totalorder %s83_s25, %s188_s1 }
  0x16   :  { %p89_p10 = pnand %p87_p9, %p84_p8 }
  0x18   :  { %92 = shalt.err (!%p89_p10)
}
  0x19   :  { %s93_s30 = scalar_lea.vmem %s27_s12, 128  ;;  %p98_p12 = scmp.lt.s32.totalorder %s27_s12, %s27_s12 }
  0x1a   :  { %p94_p11 = scmp.ne.s32.totalorder %s27_s12, %s93_s30  ;;  %p99_p13 = scmp.lt.s32.totalorder %s93_s30, %s93_s30 }
  0x1c   :  { %p100_p0 = por %p99_p13, %p98_p12 }
  0x1e   :  { %p101_p1 = pnand %p100_p0, %p94_p11 }
  0x20   :  { %104 = shalt.err (!%p101_p1)
}
  0x21   :  { %29 = dma.hbm_to_vmem [thread:$0]  %s188_s1, 128, %s27_s12, [#allocation6]  }
  0x22   :  { %127 = dma.done.wait [#allocation3], 128  }
  0x23   :  { %128 = vsyncadd [#allocation3], 4294967168 }
  0x24   :  { %129 = dma.done.wait [#allocation6], 128  }
  0x25   :  { %130 = vsyncadd [#allocation6], 4294967168  ;;  %v36_v0 = vld [vmem:[#allocation2] sm:$0xff]  ;;  %v37_v1 = vld [vmem:[#allocation5] sm:$0xff]  ;;  %s135_s4 = smov [#allocation7]  }
  0x26   :  { %s48_s5 = sshll.u32 %s135_s4, 4  ;;  %v38_v2 = vsub.f32 %v36_v0, %v37_v1  ;;  %s49_s5 = int_to_ptr.vmem [resolvable:$true] %s48_s5 }
  0x27   :  { %s105_s6 = scalar_lea.vmem %s49_s5, 128  ;;  %p110_p3 = scmp.lt.s32.totalorder %s49_s5, %s49_s5 }
  0x28   :  { %v39_v3 = vmul.f32 %v38_v2, %v38_v2  ;;  %p106_p2 = scmp.ne.s32.totalorder %s49_s5, %s105_s6  ;;  %p111_p4 = scmp.lt.s32.totalorder %s105_s6, %s105_s6 }
  0x2a   :  { %41 = vst [vmem:[#allocation7] sm:$0xff] %v39_v3  ;;  %p112_p5 = por %p111_p4, %p110_p3 }
  0x2c   :  { %p113_p6 = pnand %p112_p5, %p106_p2 }
  0x2e   :  { %116 = shalt.err (!%p113_p6)
}
  0x2f   :  { %s117_s8 = scalar_lea.hbm %s189_s2, 128 }
  0x30   :  { %p118_p7 = scmp.ne.s32.totalorder %s189_s2, %s117_s8  ;;  %p121_p8 = scmp.lt.u32.totalorder %s117_s8, %s189_s2 }
  0x32   :  { %p123_p9 = pnand %p121_p8, %p118_p7 }
  0x34   :  { %126 = shalt.err (!%p123_p9)
}
  0x35   :  { %51 = dma.vmem_to_hbm [thread:$0]  %s49_s5, 128, %s189_s2, [#allocation4]  }
  0x36   :  { %131 = dma.done.wait [#allocation4], 128  }
  0x37   :  { %132 = vsyncadd [#allocation4], 4294967168 }
  0x38   :  { %55 = vsyncpa [#allocation3], 1 }
  0x39   :  { %56 = vsyncpa [#allocation6], 1 }
  0x3a   :  { %57 = vsyncpa [#allocation4], 1 }

</bundles_post_ra>
